<compile_context>
chip_gen: v5e
topology: v5e:2x2
jax: 0.10.0
libtpu: 0.0.40
codegen_flags: <defaults>
</compile_context>

<pallas_src>
import functools

import jax
import jax.numpy as jnp
from jax.experimental import pallas as pl
from jax.experimental.pallas import tpu as pltpu

LN_EPS = 1e-5                      # torch.nn.LayerNorm default
NEG_BIG = -1e30                    # finite "-inf" (safe for exp / online softmax)


# ----------------------------------------------------------------------------
# Per-chip sizing helpers
# ----------------------------------------------------------------------------
def _tpu_vmem_bytes():
    try:
        return int(pltpu.get_tpu_info().vmem_capacity_bytes)
    except Exception:
        return 128 * 1024 * 1024


def _seq_plan(T, small_vmem):
    """(T_pad, tq, tk): MXU/lane-friendly sequence tiles; pad T rather than shrink tiles."""
    tq = 128 if small_vmem else 256
    tk_max = 256 if small_vmem else 512
    if T <= tq:
        return T, T, T                            # single full-dim tile (always legal)
    T_pad = ((T + tq - 1) // tq) * tq
    tk = tk_max if T_pad % tk_max == 0 else tq
    return T_pad, tq, tk


def _row_plan(rows, small_vmem):
    target = 256 if small_vmem else 512
    if rows <= target:
        return rows
    for cand in (target, 256, 128, 64, 32, 16):
        if rows % cand == 0:
            return cand
    return rows


def _pick_divisor_tile(n, target):
    if n <= target:
        return n
    for step in (256, 128):
        t = (target // step) * step
        while t >= step:
            if n % t == 0:
                return t
            t -= step
    return n


def _const_weight_spec(shape, index_map):
    # Constant-index weight: single-buffer it (double-buffering a block whose index
    # never changes just doubles its VMEM footprint).
    try:
        return pl.BlockSpec(shape, index_map, pipeline_mode=pl.Buffered(1))
    except Exception:
        return pl.BlockSpec(shape, index_map)


def _layer_norm(x, w, b):
    # x: (R, E) f32, w/b: (1, E) f32 -- keep elementwise math in f32
    mu = jnp.mean(x, axis=-1, keepdims=True)
    var = jnp.mean((x - mu) ** 2, axis=-1, keepdims=True)
    return (x - mu) * jax.lax.rsqrt(var + LN_EPS) * w + b


# ----------------------------------------------------------------------------
# Kernel 1: LayerNorm + fused K/V projection  ->  one lane-dense (B, T, 2E) bf16 slab
# ----------------------------------------------------------------------------
def kv_proj_kernel(x_ref, ln_w_ref, ln_b_ref, wkv_ref, kv_ref):
    x = x_ref[0]                                                    # (TR, E) f32
    xn = _layer_norm(x, ln_w_ref[...], ln_b_ref[...]).astype(jnp.bfloat16)
    # single (TR, E) @ (E, 2E) matmul, bf16 in / f32 accumulate; one lane-dense store
    kv_ref[0] = jnp.dot(xn, wkv_ref[...],
                        preferred_element_type=jnp.float32).astype(jnp.bfloat16)
    # TODO(synk): for very large E, add an "arbitrary" axis tiling the 2E output columns.


def _kv_projection(x, kp, row_tile, vmem_limit):
    B, T, E = x.shape
    return pl.pallas_call(
        kv_proj_kernel,
        out_shape=jax.ShapeDtypeStruct((B, T, 2 * E), jnp.bfloat16),
        grid=(B, T // row_tile),
        in_specs=[
            pl.BlockSpec((1, row_tile, E), lambda b, t: (b, t, 0)),
            pl.BlockSpec((1, E), lambda b, t: (0, 0)),
            pl.BlockSpec((1, E), lambda b, t: (0, 0)),
            _const_weight_spec((E, 2 * E), lambda b, t: (0, 0)),
        ],
        out_specs=pl.BlockSpec((1, row_tile, 2 * E), lambda b, t: (b, t, 0)),
        compiler_params=pltpu.CompilerParams(
            dimension_semantics=("parallel", "parallel"),
            vmem_limit_bytes=vmem_limit),
    )(x, kp["ln0w"], kp["ln0b"], kp["wkv_t"])


# ----------------------------------------------------------------------------
# Kernel 2: flash causal attention with FUSED Q projection + residual add
# grid = (B, q-tiles, kv-tiles); kv axis is the "arbitrary" reduction.
# ----------------------------------------------------------------------------
def flash_attn_kernel(x_ref, ln_w_ref, ln_b_ref, wq_ref, kv_ref, o_ref,
                      q_sc, m_sc, l_sc, acc_sc, *,
                      num_heads, head_size, tq, tk, inv_scale):
    qi = pl.program_id(1)
    ki = pl.program_id(2)
    H, c = num_heads, head_size
    E = H * c

    @pl.when(ki == 0)
    def _():
        # Fused Q projection: LN0(x) @ Wq with 1/sqrt(c) folded in; head-major only in VMEM.
        xn = _layer_norm(x_ref[0], ln_w_ref[...], ln_b_ref[...]).astype(jnp.bfloat16)
        q2d = jnp.dot(xn, wq_ref[...], preferred_element_type=jnp.float32) * inv_scale
        q_sc[...] = pltpu.einshape("qhc->hqc",
                                   q2d.astype(jnp.bfloat16).reshape(tq, H, c))
        m_sc[...] = jnp.full(m_sc.shape, NEG_BIG, jnp.float32)
        l_sc[...] = jnp.zeros(l_sc.shape, jnp.float32)
        acc_sc[...] = jnp.zeros(acc_sc.shape, jnp.float32)

    q_start = qi * tq
    k_start = ki * tk
    valid = k_start <= q_start + (tq - 1)        # tile intersects the causal region
    straddles = k_start + (tk - 1) > q_start     # tile straddles the diagonal -> needs mask

    def update(apply_mask):
        kv = kv_ref[0]                                              # (tk, 2E) bf16
        k = pltpu.einshape("khc->hkc", kv[:, :E].reshape(tk, H, c))  # (H, tk, c) bf16
        v = pltpu.einshape("khc->hkc", kv[:, E:].reshape(tk, H, c))
        s = jnp.einsum("hqc,hkc->hqk", q_sc[...], k,
                       preferred_element_type=jnp.float32)           # (H, tq, tk) f32
        if apply_mask:
            rows = q_start + jax.lax.broadcasted_iota(jnp.int32, (tq, tk), 0)
            cols = k_start + jax.lax.broadcasted_iota(jnp.int32, (tq, tk), 1)
            s = jnp.where((rows >= cols)[None, :, :], s, NEG_BIG)
        m_prev = m_sc[...]
        m_new = jnp.maximum(m_prev, jnp.max(s, axis=-1, keepdims=True))   # max stays on XLU
        alpha = jnp.exp(m_prev - m_new)
        p = jnp.exp(s - m_new).astype(jnp.bfloat16)
        # row-sum via MXU (p @ ones) to keep the XLU off the critical path
        ones = jnp.ones((tk, 1), jnp.bfloat16)
        row_sum = jnp.dot(p.reshape(H * tq, tk), ones,
                          preferred_element_type=jnp.float32).reshape(H, tq, 1)
        l_sc[...] = alpha * l_sc[...] + row_sum
        acc_sc[...] = alpha * acc_sc[...] + jnp.einsum(
            "hqk,hkc->hqc", p, v, preferred_element_type=jnp.float32)
        m_sc[...] = m_new

    @pl.when(valid & straddles)                   # diagonal tiles: masked path
    def _():
        update(True)

    @pl.when(valid & jnp.logical_not(straddles))  # interior tiles: no mask math
    def _():
        update(False)

    @pl.when(ki == pl.num_programs(2) - 1)
    def _():
        inv_l = pl.reciprocal(l_sc[...], approx=True)                 # EUP slot
        y = pltpu.einshape("hqc->qhc", acc_sc[...] * inv_l).reshape(tq, E)
        o_ref[0] = (x_ref[0] + y).astype(o_ref.dtype)                 # residual add in f32


def _flash_attention_residual(x, kv, kp, num_heads, tq, tk, vmem_limit):
    B, T, E = x.shape
    H = num_heads
    c = E // H
    nq, nk = T // tq, T // tk

    def kv_index_map(b, qi, ki):
        # Clamp at the causal diagonal: repeating the block index makes Pallas skip the
        # DMA for kv tiles that are entirely above the diagonal (~2x K/V bandwidth).
        last_valid = (qi * tq + (tq - 1)) // tk
        return (b, jnp.minimum(ki, last_valid), 0)

    kern = functools.partial(flash_attn_kernel, num_heads=H, head_size=c,
                             tq=tq, tk=tk, inv_scale=1.0 / (c ** 0.5))
    return pl.pallas_call(
        kern,
        out_shape=jax.ShapeDtypeStruct((B, T, E), jnp.bfloat16),
        grid=(B, nq, nk),
        in_specs=[
            pl.BlockSpec((1, tq, E), lambda b, qi, ki: (b, qi, 0)),
            pl.BlockSpec((1, E), lambda b, qi, ki: (0, 0)),
            pl.BlockSpec((1, E), lambda b, qi, ki: (0, 0)),
            _const_weight_spec((E, E), lambda b, qi, ki: (0, 0)),
            pl.BlockSpec((1, tk, 2 * E), kv_index_map),
        ],
        out_specs=pl.BlockSpec((1, tq, E), lambda b, qi, ki: (b, qi, 0)),
        scratch_shapes=[
            pltpu.VMEM((H, tq, c), jnp.bfloat16),    # q (pre-scaled, head-major)
            pltpu.VMEM((H, tq, 1), jnp.float32),     # running max m
            pltpu.VMEM((H, tq, 1), jnp.float32),     # running denom l
            pltpu.VMEM((H, tq, c), jnp.float32),     # output accumulator
        ],
        compiler_params=pltpu.CompilerParams(
            dimension_semantics=("parallel", "parallel", "arbitrary"),
            vmem_limit_bytes=vmem_limit),
    )(x, kp["ln0w"], kp["ln0b"], kp["wq_t"], kv)


# ----------------------------------------------------------------------------
# Kernel 3: LayerNorm + MLP (Linear -> ReLU -> Linear) + residual.
# Row-tiled over flattened (B*T, E); M is tiled on an "arbitrary" grid axis with a
# (row_tile, E) f32 accumulator; the LN result is cached in a bf16 scratch at m==0.
# ----------------------------------------------------------------------------
def mlp_kernel(x_ref, ln_w_ref, ln_b_ref, w1_ref, b1_ref, w2_ref, b2_ref, o_ref,
               xn_sc, acc_sc):
    m = pl.program_id(1)

    @pl.when(m == 0)
    def _():
        x = x_ref[...].astype(jnp.float32)
        xn_sc[...] = _layer_norm(x, ln_w_ref[...], ln_b_ref[...]).astype(jnp.bfloat16)
        acc_sc[...] = jnp.zeros(acc_sc.shape, jnp.float32)

    h = jnp.dot(xn_sc[...], w1_ref[...], preferred_element_type=jnp.float32) + b1_ref[...]
    h = jnp.maximum(h, 0.0).astype(jnp.bfloat16)
    acc_sc[...] += jnp.dot(h, w2_ref[...], preferred_element_type=jnp.float32)

    @pl.when(m == pl.num_programs(1) - 1)
    def _():
        # residual add in f32
        o_ref[...] = x_ref[...].astype(jnp.float32) + acc_sc[...] + b2_ref[...]


def _mlp_residual(x2d, kp, row_tile, tile_m, vmem_limit):
    R, E = x2d.shape
    M = kp["w1_t"].shape[1]
    return pl.pallas_call(
        mlp_kernel,
        out_shape=jax.ShapeDtypeStruct((R, E), jnp.float32),
        grid=(R // row_tile, M // tile_m),
        in_specs=[
            pl.BlockSpec((row_tile, E), lambda r, m: (r, 0)),
            pl.BlockSpec((1, E), lambda r, m: (0, 0)),
            pl.BlockSpec((1, E), lambda r, m: (0, 0)),
            pl.BlockSpec((E, tile_m), lambda r, m: (0, m)),
            pl.BlockSpec((1, tile_m), lambda r, m: (0, m)),
            pl.BlockSpec((tile_m, E), lambda r, m: (m, 0)),
            pl.BlockSpec((1, E), lambda r, m: (0, 0)),
        ],
        out_specs=pl.BlockSpec((row_tile, E), lambda r, m: (r, 0)),
        scratch_shapes=[
            pltpu.VMEM((row_tile, E), jnp.bfloat16),   # cached LN1(x) rows
            pltpu.VMEM((row_tile, E), jnp.float32),    # MLP accumulator
        ],
        compiler_params=pltpu.CompilerParams(
            dimension_semantics=("parallel", "arbitrary"),
            vmem_limit_bytes=vmem_limit),
    )(x2d, kp["ln1w"], kp["ln1b"], kp["w1_t"], kp["b1"], kp["w2_t"], kp["b2"])


# ----------------------------------------------------------------------------
# Host-side parameter prep (pre-transpose / pre-permute / bf16 cast -- done once)
# ----------------------------------------------------------------------------
def prepare_block_params(p, *, num_heads):
    E = p["ln0w"].shape[0]
    H = num_heads
    c = E // H
    # torch layout: w_attn (3E, E); per head h rows [3c*h : 3c*h+c]=Q, +c..2c=K, +2c..3c=V
    r = p["w_attn"].reshape(H, 3, c, E)
    wq = r[:, 0].reshape(E, E)                 # head-major output rows
    wk = r[:, 1].reshape(E, E)
    wv = r[:, 2].reshape(E, E)
    return {
        "wq_t": wq.T.astype(jnp.bfloat16),                                   # (E, E)
        "wkv_t": jnp.concatenate([wk.T, wv.T], axis=1).astype(jnp.bfloat16),  # (E, 2E) [K|V]
        "ln0w": p["ln0w"].reshape(1, E).astype(jnp.float32),
        "ln0b": p["ln0b"].reshape(1, E).astype(jnp.float32),
        "ln1w": p["ln1w"].reshape(1, E).astype(jnp.float32),
        "ln1b": p["ln1b"].reshape(1, E).astype(jnp.float32),
        "w1_t": p["w1"].T.astype(jnp.bfloat16),                              # (E, M)
        "b1": p["b1"].reshape(1, -1).astype(jnp.float32),
        "w2_t": p["w2"].T.astype(jnp.bfloat16),                              # (M, E)
        "b2": p["b2"].reshape(1, -1).astype(jnp.float32),
    }


def transformer_block_forward(x, kparams, *, num_heads):
    """Pallas forward of MultiHeadedCausalSelfAttentionTransformerBlock."""
    B, T, E = x.shape
    assert E % num_heads == 0

    cap = _tpu_vmem_bytes()
    small_vmem = cap <= 64 * 1024 * 1024                     # e.g. v7x: 64 MiB / TC
    vmem_limit = int(min(cap - 16 * 1024 * 1024, 100 * 1024 * 1024))

    T_pad, tq, tk = _seq_plan(T, small_vmem)
    xp = x if T_pad == T else jnp.pad(x, ((0, 0), (0, T_pad - T), (0, 0)))

    kv = _kv_projection(xp, kparams, tq, vmem_limit)                    # (B,T_pad,2E) bf16
    x1 = _flash_attention_residual(xp, kv, kparams, num_heads, tq, tk,  # (B,T_pad,E) bf16
                                   vmem_limit)

    rows = B * T_pad
    row_tile = _row_plan(rows, small_vmem)
    tile_m = _pick_divisor_tile(kparams["w1_t"].shape[1],
                                512 if small_vmem else 1024)
    out = _mlp_residual(x1.reshape(rows, E), kparams, row_tile, tile_m, vmem_limit)
    out = out.reshape(B, T_pad, E)
    return out[:, :T, :] if T_pad != T else out


# ----------------------------------------------------------------------------
# Deterministic init + pure-JAX (f32) reference mirroring the PyTorch module
# ----------------------------------------------------------------------------
def init_params(key, *, embed_size, mlp_size):
    E, M = embed_size, mlp_size
    k = jax.random.split(key, 8)
    return {
        "w_attn": 0.05 * jax.random.normal(k[0], (3 * E, E), jnp.float32),
        "ln0w": 1.0 + 0.1 * jax.random.normal(k[1], (E,), jnp.float32),
        "ln0b": 0.05 * jax.random.normal(k[2], (E,), jnp.float32),
        "ln1w": 1.0 + 0.1 * jax.random.normal(k[3], (E,), jnp.float32),
        "ln1b": 0.05 * jax.random.normal(k[4], (E,), jnp.float32),
        "w1": 0.05 * jax.random.normal(k[5], (M, E), jnp.float32),
        "b1": 0.02 * jax.random.normal(k[6], (M,), jnp.float32),
        "w2": 0.05 * jax.random.normal(k[7], (E, M), jnp.float32),
        "b2": 0.01 * jnp.ones((E,), jnp.float32),
    }


def ref_forward(x, p, *, num_heads):
    B, T, E = x.shape
    H = num_heads
    c = E // H

    def ln(z, w, b):
        mu = jnp.mean(z, axis=-1, keepdims=True)
        var = jnp.mean((z - mu) ** 2, axis=-1, keepdims=True)
        return (z - mu) / jnp.sqrt(var + LN_EPS) * w + b

    mask = jnp.where(jnp.tril(jnp.ones((T, T), jnp.float32)) > 0.0, 0.0, -jnp.inf)
    xn = ln(x, p["ln0w"], p["ln0b"])
    qkv = (xn @ p["w_attn"].T).reshape(B, T, H, 3 * c).transpose(0, 2, 1, 3)
    q, k, v = qkv[..., :c], qkv[..., c:2 * c], qkv[..., 2 * c:]
    a = q @ jnp.swapaxes(k, -1, -2) / (c ** 0.5) + mask
    pr = jax.nn.softmax(a, axis=-1)
    y = (pr @ v).transpose(0, 2, 1, 3).reshape(B, T, E)
    x1 = x + y
    x1n = ln(x1, p["ln1w"], p["ln1b"])
    return x1 + jax.nn.relu(x1n @ p["w1"].T + p["b1"]) @ p["w2"].T + p["b2"]


# ----------------------------------------------------------------------------
if __name__ == "__main__":
    embed_size = 32
    mlp_size = 64
    num_heads = 4
    B, T = 2, 8

    key = jax.random.PRNGKey(0)
    kx, kp = jax.random.split(key)
    x = jax.random.normal(kx, (B, T, embed_size), jnp.float32)
    params = init_params(kp, embed_size=embed_size, mlp_size=mlp_size)
    kparams = prepare_block_params(params, num_heads=num_heads)

    y = transformer_block_forward(x, kparams, num_heads=num_heads)
    y = jax.block_until_ready(y)

    y_ref = ref_forward(x, params, num_heads=num_heads)
    assert y.shape == (B, T, embed_size)
    max_err = float(jnp.max(jnp.abs(y - y_ref)))
    # bf16 MXU inputs, bf16 x1 intermediate and approx reciprocal vs a pure-f32 reference
    assert jnp.allclose(y, y_ref, rtol=3e-2, atol=3e-2), f"max abs err {max_err}"

    print("KERNEL_OK")
</pallas_src>

<mosaic_0001>
module attributes {stable_mosaic.version = 11 : i64} {
  func.func @kv_proj_kernel(%arg0: i32, %arg1: i32, %arg2: memref<1x8x32xf32, #tpu.memory_space<vmem>>, %arg3: memref<1x32xf32, #tpu.memory_space<vmem>>, %arg4: memref<1x32xf32, #tpu.memory_space<vmem>>, %arg5: memref<32x64xbf16, #tpu.memory_space<vmem>>, %arg6: memref<1x8x64xbf16, #tpu.memory_space<vmem>>) attributes {dimension_semantics = [#tpu.dimension_semantics<parallel>, #tpu.dimension_semantics<parallel>], iteration_bounds = array<i64: 2, 1>, scalar_prefetch = 0 : i64, scratch_operands = 0 : i64, tpu.core_type = #tpu.core_type<tc>, window_params = [{transform_indices = @transform_0, window_bounds = array<i64: 1, 8, 32>}, {pipeline_mode = #tpu.pipeline_mode<synchronous>, transform_indices = @transform_1, window_bounds = array<i64: 1, 32>}, {pipeline_mode = #tpu.pipeline_mode<synchronous>, transform_indices = @transform_2, window_bounds = array<i64: 1, 32>}, {pipeline_mode = #tpu.pipeline_mode<synchronous>, transform_indices = @transform_3, window_bounds = array<i64: 32, 64>}, {transform_indices = @transform_4, window_bounds = array<i64: 1, 8, 64>}]} {
    %c0 = arith.constant 0 : index
    %c0_0 = arith.constant 0 : index
    %c0_1 = arith.constant 0 : index
    %0 = vector.load %arg2[%c0, %c0_0, %c0_1] : memref<1x8x32xf32, #tpu.memory_space<vmem>>, vector<1x8x32xf32>
    %1 = vector.shape_cast %0 : vector<1x8x32xf32> to vector<8x32xf32>
    %c0_2 = arith.constant 0 : index
    %c0_3 = arith.constant 0 : index
    %2 = vector.load %arg3[%c0_2, %c0_3] : memref<1x32xf32, #tpu.memory_space<vmem>>, vector<1x32xf32>
    %c0_4 = arith.constant 0 : index
    %c0_5 = arith.constant 0 : index
    %3 = vector.load %arg4[%c0_4, %c0_5] : memref<1x32xf32, #tpu.memory_space<vmem>>, vector<1x32xf32>
    %cst = arith.constant dense<0.000000e+00> : vector<8xf32>
    %4 = vector.multi_reduction <add>, %1, %cst [1] : vector<8x32xf32> to vector<8xf32>
    %5 = vector.shape_cast %4 : vector<8xf32> to vector<8x1xf32>
    %cst_6 = arith.constant 3.200000e+01 : f32
    %6 = vector.broadcast %cst_6 : f32 to vector<8x1xf32>
    %7 = arith.divf %5, %6 : vector<8x1xf32>
    %8 = vector.broadcast %7 : vector<8x1xf32> to vector<8x32xf32>
    %9 = arith.subf %1, %8 : vector<8x32xf32>
    %10 = arith.mulf %9, %9 : vector<8x32xf32>
    %cst_7 = arith.constant dense<0.000000e+00> : vector<8xf32>
    %11 = vector.multi_reduction <add>, %10, %cst_7 [1] : vector<8x32xf32> to vector<8xf32>
    %12 = vector.shape_cast %11 : vector<8xf32> to vector<8x1xf32>
    %cst_8 = arith.constant 3.200000e+01 : f32
    %13 = vector.broadcast %cst_8 : f32 to vector<8x1xf32>
    %14 = arith.divf %12, %13 : vector<8x1xf32>
    %15 = vector.broadcast %7 : vector<8x1xf32> to vector<8x32xf32>
    %16 = arith.subf %1, %15 : vector<8x32xf32>
    %cst_9 = arith.constant 9.99999974E-6 : f32
    %17 = vector.broadcast %cst_9 : f32 to vector<8x1xf32>
    %18 = arith.addf %14, %17 : vector<8x1xf32>
    %19 = math.rsqrt %18 : vector<8x1xf32>
    %20 = vector.broadcast %19 : vector<8x1xf32> to vector<8x32xf32>
    %21 = arith.mulf %16, %20 : vector<8x32xf32>
    %22 = vector.broadcast %2 : vector<1x32xf32> to vector<8x32xf32>
    %23 = arith.mulf %21, %22 : vector<8x32xf32>
    %24 = vector.broadcast %3 : vector<1x32xf32> to vector<8x32xf32>
    %25 = arith.addf %23, %24 : vector<8x32xf32>
    %26 = arith.truncf %25 : vector<8x32xf32> to vector<8x32xbf16>
    %c0_10 = arith.constant 0 : index
    %c0_11 = arith.constant 0 : index
    %27 = vector.load %arg5[%c0_10, %c0_11] : memref<32x64xbf16, #tpu.memory_space<vmem>>, vector<32x64xbf16>
    %cst_12 = arith.constant dense<0.000000e+00> : vector<8x64xf32>
    %28 = tpu.matmul %26, %27, %cst_12 {dimension_numbers = #tpu.dot_dimension_numbers<[1], [0], [0], [1], [0, 0, 1, 1], [], []>} : vector<8x32xbf16>, vector<32x64xbf16>, vector<8x64xf32> -> vector<8x64xf32>
    %29 = arith.truncf %28 : vector<8x64xf32> to vector<8x64xbf16>
    %c0_13 = arith.constant 0 : index
    %c0_14 = arith.constant 0 : index
    %c0_15 = arith.constant 0 : index
    %30 = vector.load %arg6[%c0_13, %c0_14, %c0_15] : memref<1x8x64xbf16, #tpu.memory_space<vmem>>, vector<1x8x64xbf16>
    %31 = vector.shape_cast %30 : vector<1x8x64xbf16> to vector<8x64xbf16>
    %32 = vector.shape_cast %29 : vector<8x64xbf16> to vector<1x8x64xbf16>
    tpu.vector_store %arg6[%c0_13, %c0_14, %c0_15], %32 {strides = array<i32>} : memref<1x8x64xbf16, #tpu.memory_space<vmem>>, vector<1x8x64xbf16>,
    return
  }
  func.func @transform_0(%arg0: i32, %arg1: i32) -> (i32, i32, i32) {
    %c0_i32 = arith.constant 0 : i32
    %c0_i32_0 = arith.constant 0 : i32
    return %arg0, %arg1, %c0_i32 : i32, i32, i32
  }
  func.func @transform_1(%arg0: i32, %arg1: i32) -> (i32, i32) {
    %c0_i32 = arith.constant 0 : i32
    %c0_i32_0 = arith.constant 0 : i32
    %c0_i32_1 = arith.constant 0 : i32
    return %c0_i32, %c0_i32_0 : i32, i32
  }
  func.func @transform_2(%arg0: i32, %arg1: i32) -> (i32, i32) {
    %c0_i32 = arith.constant 0 : i32
    %c0_i32_0 = arith.constant 0 : i32
    %c0_i32_1 = arith.constant 0 : i32
    return %c0_i32, %c0_i32_0 : i32, i32
  }
  func.func @transform_3(%arg0: i32, %arg1: i32) -> (i32, i32) {
    %c0_i32 = arith.constant 0 : i32
    %c0_i32_0 = arith.constant 0 : i32
    %c0_i32_1 = arith.constant 0 : i32
    return %c0_i32, %c0_i32_0 : i32, i32
  }
  func.func @transform_4(%arg0: i32, %arg1: i32) -> (i32, i32, i32) {
    %c0_i32 = arith.constant 0 : i32
    %c0_i32_0 = arith.constant 0 : i32
    return %arg0, %arg1, %c0_i32 : i32, i32, i32
  }
}

</mosaic_0001>

<bundles_post_ra>
// kernel: tpu_custom_call.1
= control target key start
LH: loop header
LB: loop body
LE: loop exit
PB: predicated region body
PF: predicated region fallthrough
CT: control target
= control target key end

     0   :  { %9 = vsyncpa [#allocation3], 0  ;;  %s938_s0 = inlined_call_operand.hbm [shape: f32[2,8,32], index: 0, kind: input, shape index: {}]   ;;  %s939_s1 = inlined_call_operand.hbm [shape: f32[1,32], index: 1, kind: input, shape index: {}]   ;;  %s940_s2 = inlined_call_operand.vmem [shape: f32[1,32], index: 2, kind: input, shape index: {}]   ;;  %s941_s3 = inlined_call_operand.hbm [shape: bf16[32,64], index: 3, kind: input, shape index: {}]   ;;  %s942_s4 = inlined_call_operand.hbm [shape: bf16[2,8,64], index: 4, kind: output, shape index: {}]  }
   0x1   :  { %11 = vsyncpa [#allocation3 + $0x1], 0 }
   0x2   :  { %12 = vsyncpa [#allocation6], 0 }
   0x3   :  { %13 = vsyncpa [#allocation4], 0 }
   0x4   :  { %15 = vsyncpa [#allocation4 + $0x1], 0  ;;  %s785_s15 = smov 0   ;;  %s787_s16 = smov 0  }
   0x5   :  { %s789_s17 = smov 0   ;;  %s791_s18 = smov 0  }
   0x6   :  { %s793_s19 = smov 0   ;;  %s795_s20 = smov 0  }
   0x7 LB: > { %s457_s21 = sadd.s32 4294967295, %s753_s20   ;;  %s458_s22 = sadd.s32 4294967294, %s753_s20   ;;  %s753_s20 = sphi %s795_s20, %s21_s20   ;;  %s749_s19 = sphi %s793_s19, %s952_s19   ;;  %s745_s18 = sphi %s791_s18, %s951_s18   ;;  %s741_s17 = sphi %s789_s17, %s950_s17   ;;  %s737_s16 = sphi %s787_s16, %s949_s16   ;;  %s733_s15 = sphi %s785_s15, %s948_s15  }
   0x8   : > { %p55_p0 = scmp.ne.s32.totalorder %s737_s16, %s733_s15  ;;  %p821_p1 = scmp.eq.s32.totalorder %s457_s21, 0 }
   0x9   : > { %p150_p2 = scmp.eq.s32.totalorder %s458_s22, 1  ;;  %p459_p4 = scmp.ge.s32.totalorder %s753_s20, 1 }
   0xa   : > { %p827_p3 = por %p821_p1, %p55_p0  ;;  %p157_p6 = scmp.lt.s32.totalorder %s753_s20, 3 }
   0xb   : > { %p832_p5 = por %p150_p2, %p55_p0  ;;  %s169_s28 = sshll.u32 %s939_s1, 4  ;;  %s170_s28 = int_to_ptr.hbm [resolvable:$true] %s169_s28 }
   0xc   : > { %p840_p7 = pnand %p459_p4, %p157_p6  ;;  %p462_p8 = scmp.ge.s32.totalorder %s753_s20, 2 }
   0xd   : > { %s755_s30 = smov [#allocation5]   ;;  %s183_s8 = sshll.u32 %s941_s3, 4  ;;  %s184_s8 = int_to_ptr.hbm [resolvable:$true] %s183_s8 }
   0xe   : > { %p497_p9 = pneg %p840_p7  ;;  %s171_s5 = sshll.u32 %s755_s30, 4  ;;  %s172_s5 = int_to_ptr.vmem [resolvable:$true] %s171_s5 }
   0xf   : > { %s756_s9 = smov [#allocation7]   ;;  %s757_s11 = smov 64  }
  0x10   : > { %p498_p10 = pnand %p497_p9, %p821_p1  ;;  %s185_s10 = sshll.u32 %s756_s9, 4  ;;  %s186_s10 = int_to_ptr.vmem [resolvable:$true] %s185_s10 }
  0x11   : > { %s758_s12 = smov 4   ;;  %p144_p11 = scmp.eq.s32.totalorder %s457_s21, 1 }
  0x12   : > { %500 = dma.hbm_to_vmem [thread:$0]  (!%p498_p10), %s170_s28, 16, %s172_s5, [#allocation6]  }
  0x13   : > { %503 = dma.hbm_to_vmem [thread:$0]  (!%p498_p10), %s184_s8, 256, %s186_s10, [#allocation6], %s757_s11, %s757_s11, %s758_s12  }
  0x14   : > { %s33_s13 = sadd.s32 1, %s749_s19  ;;  %s42_s14 = sadd.s32 1, %s741_s17 }
  0x15   : > { %p35_p12 = scmp.ge.s32.totalorder %s33_s13, 2  ;;  %p49_p13 = scmp.ne.s32.totalorder %s741_s17, %s737_s16 }
  0x16   : > { %p50_p0 = scmp.eq.s32.totalorder %s753_s20, 0  ;;  %p514_p4 = scmp.lt.s32.totalorder %s753_s20, 2 }
  0x17   : > { %s954_s13 = smov (%p35_p12, %s33_s13), 0  ;;  %p861_p2 = por %p144_p11, %p49_p13 }
  0x18   : > { %s37_s26 = ssub.s32 %s749_s19, %s954_s13  ;;  %s199_s27 = sand.u32 1, %s741_s17  }
  0x19   : > { %p40_p6 = scmp.eq.s32.totalorder %s37_s26, 0  ;;  %p51_p9 = por %p50_p0, %p49_p13 }
  0x1a   : > { %s463_s28 = sshll.u32 %s199_s27, 3  ;;  %s464_s21 = sshll.u32 %s749_s19, 3 }
  0x1b   : > { %s871_s30 = scalar_select %p40_p6, %s741_s17, %s42_s14  }
  0x1c   : > { %s208_s7 = scalar_lea.hbm %s938_s0, %s464_s21  ;;  %s203_s9 = scalar_lea.vmem [#allocation2], %s463_s28 }
  0x1d   : > { %s210_s8 = sshll.u32 %s208_s7, 4  ;;  %s212_s10 = sshll.u32 %s203_s9, 4  ;;  %s211_s8 = int_to_ptr.hbm [resolvable:$true] %s210_s8  ;;  %s213_s10 = int_to_ptr.vmem [resolvable:$true] %s212_s10 }
  0x1e   : > { %p505_p10 = pnand %p514_p4, %p51_p9  ;;  %s200_s11 = scalar_lea.sflag [#allocation3], %s199_s27 }
  0x1f   : > { %221 = sbr.rel (%p840_p7) target bundleno = 444 (0x1bc), region = 36  ;;  %s881_s12 = sand.u32 (!%p840_p7), 1, %s737_s16  }
  0x20   : > { %507 = dma.hbm_to_vmem [thread:$0]  (!%p505_p10), %s211_s8, 128, %s213_s10, %s200_s11  }
  0x21   : > { %s466_s14 = sshll.u32 (!%p840_p7), %s881_s12, 3  ;;  %s224_s26 = scalar_lea.sflag (!%p840_p7), [#allocation3], %s881_s12 }
  0x22   : > { %s227_s21 = scalar_lea.vmem (!%p840_p7), [#allocation2], %s466_s14 }
  0x24   : > { %720 = dma.done.wait (%p827_p3), %s224_s26, 128  }
  0x25   : > { %722 = vsyncadd (%p827_p3), %s224_s26, 4294967168 }
  0x26   : > { %724 = dma.done.wait (%p821_p1), [#allocation6], 272  }
  0x27   : > { %726 = vsyncadd (%p821_p1), [#allocation6], 4294967024  ;;  %vm267_vm0 = vcmask 261120   ;;  %v264_v0 = vld [vmem:[%s227_s21] sm:$0xff]  ;;  %v759_v2 = vmov 32.0   ;;  %v483_v15 = vld [vmem:[#allocation7] sm:$0xff] }
  0x28   : > { %v268_v1 = vsel %vm267_vm0, %v264_v0, 0.0  ;;  %573 = vrcp.f32 %v759_v2  ;;  %v484_v14 = vld [vmem:[#allocation7 + $0x8] sm:$0xff]  ;;  %v571_v25 = vld [vmem:[#allocation5] ss:$0 sm:$0xff]  ;;  %s480_s29 = sshll.u32 %s745_s18, 2  ;;  %s469_s27 = sshll.u32 %s881_s12, 2 }
  0x29   : > { %269 = vadd.xlane.f32.xlu0 %v268_v1  ;;  %331 = vmatpush.bf16.msra.mxu0 %v484_v14  ;;  %v572_v28 = vld [vmem:[%s940_s2] ss:$0 sm:$0xff]  ;;  %s353_s6 = scalar_lea.hbm %s942_s4, %s480_s29  ;;  %s262_s7 = scalar_lea.vmem [#allocation8], %s469_s27  ;;  %vm339_vm5 = vcmask 519168  }
  0x2a   : > { %s355_s8 = sshll.u32 %s262_s7, 4  ;;  %s357_s9 = sshll.u32 %s353_s6, 4  ;;  %s356_s8 = int_to_ptr.vmem [resolvable:$true] %s355_s8  ;;  %s358_s9 = int_to_ptr.hbm [resolvable:$true] %s357_s9 }
  0x2b   : > { %s342_s10 = scalar_lea.sflag [#allocation4], %s881_s12  ;;  %s681_s11 = sshra.s32 %s358_s9, 4  ;;  %s682_s11 = int_to_ptr.hbm [resolvable:$true] %s681_s11 }
  0x2c   : > { %s683_s14 = scalar_lea.hbm %s682_s11, 4  ;;  %s687_s21 = scalar_lea.hbm %s942_s4, 8 }
  0x2d   : > { %332 = vmatpush.bf16.msra.mxu0 %v483_v15  ;;  %p684_p1 = scmp.ne.s32.totalorder %s682_s11, %s683_s14  ;;  %p688_p11 = scmp.lt.s32.totalorder %s682_s11, %s942_s4 }
  0x2e   : > { %v574_v3 = vpop.eup %573  ;;  %p689_p12 = scmp.lt.s32.totalorder %s687_s21, %s683_s14 }
  0x2f   : > { %v272_v4 = vmul.f32 32.0, %v574_v3  ;;  %vm276_vm1 = vweird.f32 %v574_v3  ;;  %p685_p3 = pnand %p684_p1, %p861_p2 }
  0x30   : > { %p690_p13 = por %p689_p12, %p688_p11 }
  0x31   : > { %v273_v5 = vsub.f32 1.0, %v272_v4  ;;  %p686_p7 = pneg %p685_p3 }
  0x33   : > { %v274_v6 = vmul.f32 %v574_v3, %v273_v5  ;;  %p691_p0 = pnand %p690_p13, %p686_p7 }
  0x35   : > { %v275_v7 = vadd.f32 %v574_v3, %v274_v6 }
  0x37   : > { %v277_v8 = vsel %vm276_vm1, %v574_v3, %v275_v7 }
  0x9c   : > { %v270_v9 = vpop.xlane.xlu0 %269 }
  0x9d   : > { %v278_v10 = vmul.f32 %v277_v8, %v270_v9 }
  0x9f   : > { %v279_v11 = vsub.f32 %v264_v0, %v278_v10 }
  0xa1   : > { %v280_v12 = vmul.f32 %v279_v11, %v279_v11 }
  0xa3   : > { %v281_v13 = vsel %vm267_vm0, %v280_v12, 0.0 }
  0xa4   : > { %282 = vadd.xlane.f32.xlu0 %v281_v13 }
 0x117   : > { %v283_v16 = vpop.xlane.xlu0 %282 }
 0x118   : > { %v284_v17 = vmul.f32 %v283_v16, %v277_v8 }
 0x11a   : > { %v285_v18 = vadd.f32 1e-05, %v284_v17 }
 0x11c   : > { %575 = vrsqrt.f32 %v285_v18  ;;  %vm292_vm3 = vweird.f32 %v285_v18 }
 0x122   : > { %v576_v19 = vpop.eup %575 }
 0x123   : > { %v287_v20 = vmul.f32 %v576_v19, %v285_v18  ;;  %vm293_vm2 = vweird.f32 %v576_v19 }
 0x124   : > { %vm294_vm4 = vmor %vm292_vm3, %vm293_vm2 }
 0x125   : > { %v288_v21 = vmul.f32 %v576_v19, %v287_v20 }
 0x127   : > { %v289_v22 = vmul.f32 0.5, %v288_v21 }
 0x129   : > { %v290_v23 = vsub.f32 1.5, %v289_v22 }
 0x12b   : > { %v291_v24 = vmul.f32 %v576_v19, %v290_v23 }
 0x12d   : > { %v295_v26 = vsel %vm294_vm4, %v576_v19, %v291_v24 }
 0x12e   : > { %v296_v27 = vmul.f32 %v295_v26, %v279_v11 }
 0x130   : > { %v300_v29 = vmul.f32 %v571_v25, %v296_v27 }
 0x132   : > { %v304_v30 = vadd.f32 %v572_v28, %v300_v29 }
 0x134   : > { %v305_v31 = vpack.c.bf16 %v304_v30, %v304_v30 }
 0x136   : > { %478 = vmatmul.msk.bf16.vlgmr.msra.gmra.mxu0 %vm267_vm0, %v305_v31 }
 0x1b3   : > { %v334_v32 = vpop.f32.mrf.mxu0 }
 0x1b4   : > { %v338_v33 = vpack.c.bf16 %v334_v32, %v334_v32 }
 0x1b6   : > { %340 = vst.msk [vmem:[%s262_s7] sm:$0xf] %vm339_vm5, %v338_v33 }
 0x1b7   : > { %694 = shalt.err (!%p691_p0)
}
 0x1b8   : > { %495 = dma.vmem_to_hbm [thread:$0]  (%p861_p2), %s356_s8, 64, %s358_s9, %s342_s10  }
 0x1bb   : > { %v336_v34 = vpop.f32.mrf.mxu0 }
 0x1bc PF: > { %s369_s12 = sand.u32 1, %s733_s15   ;;  %p509_p4 = pnand %p462_p8, %p832_p5 }
 0x1bd   : > { %s370_s29 = scalar_lea.sflag [#allocation4], %s369_s12 }
 0x1be   : > { %p510_p6 = pneg %p509_p4 }
 0x1c0   : > { %728 = dma.done.wait (%p510_p6), %s370_s29, 64  }
 0x1c1   : > { %730 = vsyncadd (%p510_p6), %s370_s29, 4294967232  ;;  %s21_s20 = sadd.s32 1, %s753_s20   ;;  %s948_s15 = smov %s737_s16 }
 0x1c2   : > { %p18_p9 = scmp.ge.s32.totalorder %s21_s20, 4   ;;  %s949_s16 = smov %s741_s17 }
 0x1c3   : > { %s950_s17 = smov %s871_s30  ;;  %s951_s18 = smov %s749_s19 }
 0x1c4   : > { %s952_s19 = smov %s954_s13  ;;  %20 = sbr.rel (!%p18_p9) target bundleno = 7 (0x7), region = 89 }
 0x1c9   :  { %376 = vsyncpa [#allocation3], 1 }
 0x1ca   :  { %378 = vsyncpa [#allocation3 + $0x1], 1 }
 0x1cb   :  { %379 = vsyncpa [#allocation6], 1 }
 0x1cc   :  { %380 = vsyncpa [#allocation4], 1 }
 0x1cd   :  { %382 = vsyncpa [#allocation4 + $0x1], 1 }

</bundles_post_ra>
